<compile_context>
chip_gen: v6e
topology: v6e:2x2x1
jax: 0.10.0
libtpu: 0.0.40
codegen_flags: <defaults>
</compile_context>

<pallas_src>
import functools

import jax
import jax.numpy as jnp
from jax import lax
from jax.experimental import pallas as pl
from jax.experimental.pallas import tpu as pltpu

# Rows of the per-layer "small vector" slab: every (d_model,)-sized parameter is
# packed into one (9, D) block so it rides a single BlockSpec / DMA descriptor.
_VEC_ROWS = ("bq", "bk", "bv", "bo", "b2", "ln1_g", "ln1_b", "ln2_g", "ln2_b")


def _layer_norm(v, g, b, eps=1e-5):
    # Matches nn.LayerNorm(d_model): biased variance, default eps.
    mu = jnp.mean(v, axis=-1, keepdims=True)
    var = jnp.mean(jnp.square(v - mu), axis=-1, keepdims=True)
    return (v - mu) * lax.rsqrt(var + eps) * g + b


# ---------------------------------------------------------------------------
# Kernel: one grid step = (batch block, encoder layer).
# ---------------------------------------------------------------------------
def _encoder_stack_kernel(x_ref, wqkv_ref, wo_ref, w1_ref, w2_ref,
                          vec_ref, b1_ref, out_ref, act_ref, cat_ref,
                          *, n_heads, bb, L, D, compute_dtype):
    layer = pl.program_id(1)
    M = bb * L

    @pl.when(layer == 0)
    def _():
        # (Re-)load the activation for this batch block at the first layer.
        act_ref[...] = x_ref[...].reshape(M, D).astype(jnp.float32)

    x2d = act_ref[...]                       # (M, D) f32 resident activation
    vec = vec_ref[...]                       # (9, D) f32 slab of biases / LN params
    bq, bk, bv, bo, b2 = vec[0:1], vec[1:2], vec[2:3], vec[3:4], vec[4:5]
    g1, be1, g2, be2 = vec[5:6], vec[6:7], vec[7:8], vec[8:9]

    def mm(a, b):
        # Operands are already in compute_dtype; accumulate in f32 on the MXU.
        return jnp.dot(a, b, preferred_element_type=jnp.float32)

    # --- fused QKV projection: one (M, D) x (D, 3D) MXU pass ------------------
    xc = x2d.astype(compute_dtype)           # hoisted cast (used once)
    qkv = mm(xc, wqkv_ref[...])              # (M, 3D) f32
    q = (qkv[:, 0:D] + bq).astype(compute_dtype)
    k = (qkv[:, D:2 * D] + bk).astype(compute_dtype)
    v = (qkv[:, 2 * D:3 * D] + bv).astype(compute_dtype)

    dh = D // n_heads
    scale = 1.0 / (dh ** 0.5)                # torch scales by d_model_out**0.5 == dh**0.5
    for h in range(n_heads):                 # static unroll; scores are per-head
        sl = slice(h * dh, (h + 1) * dh)
        qh = q[:, sl].reshape(bb, L, dh)
        kh = k[:, sl].reshape(bb, L, dh)
        vh = v[:, sl].reshape(bb, L, dh)
        s = jnp.einsum("bqd,bkd->bqk", qh, kh,
                       preferred_element_type=jnp.float32) * scale
        # nn.Softmax(dim=1): normalize over the QUERY axis (faithful to the
        # PyTorch reference, even though standard attention normalizes over keys).
        s = s - jnp.max(s, axis=1, keepdims=True)
        e = jnp.exp(s)
        attn = e * pl.reciprocal(jnp.sum(e, axis=1, keepdims=True), approx=True)
        head = jnp.einsum("bqk,bkd->bqd", attn.astype(compute_dtype), vh,
                          preferred_element_type=jnp.float32)
        # Write each head's output straight into its lane column block: bounds
        # live ranges to one head and removes the Python-list + concatenate copies.
        cat_ref[:, sl] = head.reshape(M, dh).astype(compute_dtype)

    # torch: concat heads on dim=-1 then reshape(*value.size()) == the slab layout.
    mha = mm(cat_ref[...], wo_ref[...]) + bo

    # EncoderBlock: dropout = identity; LN1 applied to the attention output
    # (NO residual before LN1 -- matches torch).
    x1 = _layer_norm(mha, g1, be1)

    # --- feed-forward: Linear -> ReLU -> (dropout = identity) -> Linear -------
    x1c = x1.astype(compute_dtype)           # hoisted cast
    h1 = jnp.maximum(mm(x1c, w1_ref[...]) + b1_ref[...], 0.0)
    ff = mm(h1.astype(compute_dtype), w2_ref[...]) + b2
    y = _layer_norm(x1 + ff, g2, be2)

    act_ref[...] = y                         # stays resident for the next layer

    @pl.when(layer == pl.num_programs(1) - 1)
    def _():
        out_ref[...] = y.reshape(bb, L, D).astype(out_ref.dtype)


# ---------------------------------------------------------------------------
# Wrapper: chip-aware batch-block selection + explicit VMEM limit.
# ---------------------------------------------------------------------------
def _tpu_vmem_and_targets():
    """(physical VMEM bytes, target M rows, prefer >=2 batch blocks) per chip gen."""
    kind = ""
    try:
        kind = jax.devices()[0].device_kind.lower()
    except Exception:
        pass
    if "v7" in kind:
        return 64 << 20, 512, True           # 64 MiB / TC; keep both TensorCores fed
    if "v6" in kind:
        return 128 << 20, 1024, False        # roofline knee ~650 FLOP/B -> M ~ 1024
    if "v5" in kind:
        return 128 << 20, 512, False         # knee ~240 FLOP/B -> M ~ 256-512, nb=1 ok
    return 64 << 20, 512, False              # conservative default


def _estimate_vmem_bytes(bb, L, D, DH, w_bytes, x_bytes, out_bytes):
    """Rough per-call VMEM footprint: double-buffered weights & blocks, scratch,
    and the large in-kernel f32/bf16 temporaries (qkv, q/k/v, h1, LN temps)."""
    M = bb * L
    weights = 2 * (4 * D * D + 2 * D * DH) * w_bytes        # wqkv + wo + w1 + w2
    vecs = 2 * (9 * D + DH) * 4                             # vec slab + b1
    blocks = 2 * M * D * (x_bytes + out_bytes)              # x in / out blocks
    scratch = M * D * (4 + w_bytes)                         # act (f32) + cat slabs
    temps = M * (3 * D * (4 + w_bytes) + DH * (4 + w_bytes) + 4 * D * 4)
    return weights + vecs + blocks + scratch + temps


def _pick_batch_block(B, L, D, DH, *, w_bytes, x_bytes, out_bytes,
                      vmem_budget, target_rows, prefer_multicore):
    """Largest divisor of B whose working set fits the VMEM budget and whose
    row count bb*L stays near the chip's roofline-knee target.  On v7x, prefer
    >=2 batch blocks (one per TensorCore); on v5e/v6e allow nb=1."""
    divisors = [d for d in range(1, B + 1) if B % d == 0]
    fits = [d for d in divisors
            if _estimate_vmem_bytes(d, L, D, DH, w_bytes, x_bytes, out_bytes)
            <= vmem_budget] or [1]
    capped = [d for d in fits if d * L <= target_rows] or [min(fits)]
    if prefer_multicore:
        multi = [d for d in capped if B // d >= 2]
        if multi:
            return max(multi)
    return max(capped)


def transformer_encoder_pallas(x, params, *, n_heads,
                               batch_block=None, compute_dtype=jnp.bfloat16):
    """Run the full TransformerEncoderLayer stack.  x: (B, L, D).
    params: dict of layer-stacked arrays (leading axis = n_encoders)."""
    B, L, D = x.shape
    assert D % n_heads == 0
    NL = params["wq"].shape[0]
    DH = params["w1"].shape[-1]

    w_bytes = jnp.dtype(compute_dtype).itemsize
    x_bytes = jnp.dtype(compute_dtype).itemsize     # x is streamed in compute_dtype
    out_bytes = jnp.dtype(x.dtype).itemsize

    phys_vmem, target_rows, prefer_multicore = _tpu_vmem_and_targets()
    vmem_budget = int(phys_vmem * 0.8)              # leave headroom for compiler scratch
    if batch_block is None:
        batch_block = _pick_batch_block(
            B, L, D, DH, w_bytes=w_bytes, x_bytes=x_bytes, out_bytes=out_bytes,
            vmem_budget=vmem_budget, target_rows=target_rows,
            prefer_multicore=prefer_multicore)
    assert B % batch_block == 0
    nb = B // batch_block

    est = _estimate_vmem_bytes(batch_block, L, D, DH, w_bytes, x_bytes, out_bytes)
    vmem_limit = int(max(min(vmem_budget, est + (16 << 20)), 32 << 20))

    # Fused QKV weight: output columns [0:D]=Q, [D:2D]=K, [2D:3D]=V.
    wqkv = jnp.concatenate(
        [params["wq"], params["wk"], params["wv"]], axis=-1).astype(compute_dtype)
    wo = params["wo"].astype(compute_dtype)
    w1 = params["w1"].astype(compute_dtype)
    w2 = params["w2"].astype(compute_dtype)
    vec_slab = params["vec"].astype(jnp.float32)    # (NL, 9, D)
    b1 = params["b1"].astype(jnp.float32)           # (NL, 1, DH)

    # The input is only read once (layer 0) into the f32 activation scratch, so
    # stream it in compute_dtype to halve its HBM/VMEM footprint.
    x_in = x.astype(compute_dtype)

    act_spec = pl.BlockSpec((batch_block, L, D), lambda i, l: (i, 0, 0))

    def wspec(a, b):
        # One layer's worth of a stacked parameter; leading layer dim squeezed.
        return pl.BlockSpec((None, a, b), lambda i, l: (l, 0, 0))

    kernel = functools.partial(_encoder_stack_kernel, n_heads=n_heads,
                               bb=batch_block, L=L, D=D, compute_dtype=compute_dtype)

    # TODO(synk): optional attention mask is not supported (the reference
    # TransformerEncoderLayer.forward never forwards it to the sublayers).
    # TODO(synk): v7x-only follow-ups: fp8 weight storage and DH-chunked FFN
    # weights to fit very large D/DH under the 64 MiB VMEM ceiling.
    return pl.pallas_call(
        kernel,
        out_shape=jax.ShapeDtypeStruct((B, L, D), x.dtype),
        grid_spec=pltpu.PrefetchScalarGridSpec(
            num_scalar_prefetch=0,
            grid=(nb, NL),                      # layer axis innermost -> activation stays in VMEM
            in_specs=[act_spec,
                      wspec(D, 3 * D), wspec(D, D),
                      wspec(D, DH), wspec(DH, D),
                      wspec(len(_VEC_ROWS), D), wspec(1, DH)],
            out_specs=act_spec,
            scratch_shapes=[pltpu.VMEM((batch_block * L, D), jnp.float32),
                            pltpu.VMEM((batch_block * L, D), compute_dtype)]),
        compiler_params=pltpu.CompilerParams(
            dimension_semantics=("parallel", "arbitrary"),
            vmem_limit_bytes=vmem_limit),
    )(x_in, wqkv, wo, w1, w2, vec_slab, b1)


# ---------------------------------------------------------------------------
# Deterministic parameter init (fused layout) + pure-JAX reference (per-head,
# mirroring the PyTorch module structurally) for validation.
# ---------------------------------------------------------------------------
def init_params(key, n_layers, d_model, d_hidden):
    """Fused weights: column block [h*dh:(h+1)*dh] of wq/wk/wv is head h's Wq.T."""
    layer_keys = jax.random.split(key, n_layers)

    def one(k):
        ks = jax.random.split(k, 12)
        w = lambda kk, fan_in, shape: (jax.random.normal(kk, shape, jnp.float32)
                                       / jnp.sqrt(jnp.float32(fan_in)))
        b = lambda kk, shape: 0.01 * jax.random.normal(kk, shape, jnp.float32)
        return dict(
            wq=w(ks[0], d_model, (d_model, d_model)), bq=b(ks[6], (d_model,)),
            wk=w(ks[1], d_model, (d_model, d_model)), bk=b(ks[7], (d_model,)),
            wv=w(ks[2], d_model, (d_model, d_model)), bv=b(ks[8], (d_model,)),
            wo=w(ks[3], d_model, (d_model, d_model)), bo=b(ks[9], (d_model,)),
            w1=w(ks[4], d_model, (d_model, d_hidden)), b1=b(ks[10], (d_hidden,)),
            w2=w(ks[5], d_hidden, (d_hidden, d_model)), b2=b(ks[11], (d_model,)),
            ln1_g=jnp.ones((d_model,), jnp.float32), ln1_b=jnp.zeros((d_model,), jnp.float32),
            ln2_g=jnp.ones((d_model,), jnp.float32), ln2_b=jnp.zeros((d_model,), jnp.float32),
        )

    layers = [one(k) for k in layer_keys]
    stacked = {n: jnp.stack([lp[n] for lp in layers])
               for n in ("wq", "wk", "wv", "wo", "w1", "w2")}
    stacked["vec"] = jnp.stack([jnp.stack([lp[r] for r in _VEC_ROWS]) for lp in layers])
    stacked["b1"] = jnp.stack([lp["b1"][None, :] for lp in layers])
    return stacked, layers


def _ref_mha(x, p, n_heads):
    B, L, D = x.shape
    dh = D // n_heads
    heads = []
    for h in range(n_heads):                      # per-head, as in the PyTorch ModuleList
        sl = slice(h * dh, (h + 1) * dh)
        q = x @ p["wq"][:, sl] + p["bq"][sl]
        k = x @ p["wk"][:, sl] + p["bk"][sl]
        v = x @ p["wv"][:, sl] + p["bv"][sl]
        score = jnp.einsum("bqd,bkd->bqk", q, k) / (dh ** 0.5)
        attn = jax.nn.softmax(score, axis=1)      # nn.Softmax(dim=1): query axis
        heads.append(jnp.einsum("bqk,bkd->bqd", attn, v))
    cat = jnp.concatenate(heads, axis=-1).reshape(B, L, D)
    return cat @ p["wo"] + p["bo"]


def _ref_block(x, p, n_heads):
    a = _ref_mha(x, p, n_heads)
    x1 = _layer_norm(a, p["ln1_g"], p["ln1_b"])   # NO residual before LN1 (matches torch)
    h = jax.nn.relu(x1 @ p["w1"] + p["b1"])
    ff = h @ p["w2"] + p["b2"]
    return _layer_norm(x1 + ff, p["ln2_g"], p["ln2_b"])


def _quantize_weights(layers, compute_dtype):
    out = []
    for p in layers:
        q = dict(p)
        for n in ("wq", "wk", "wv", "wo", "w1", "w2"):
            q[n] = p[n].astype(compute_dtype).astype(jnp.float32)
        out.append(q)
    return out


if __name__ == "__main__":
    # Small shapes consistent with the module: n_encoders=2, n_heads=2,
    # d_model=32, d_hidden=64, batch=2, seq=8.
    B, L, D, H, D_HIDDEN, N_ENCODERS = 2, 8, 32, 2, 64, 2

    key = jax.random.PRNGKey(0)
    kx, kp = jax.random.split(key)
    x = jax.random.normal(kx, (B, L, D), jnp.float32)
    stacked, layers = init_params(kp, N_ENCODERS, D, D_HIDDEN)

    out = jax.block_until_ready(
        transformer_encoder_pallas(x, stacked, n_heads=H, compute_dtype=jnp.bfloat16))

    # Reference in f32 with the same bf16-rounded weights the kernel uses; the
    # kernel also sees a bf16-rounded input x.
    with jax.default_matmul_precision("highest"):
        ref = x.astype(jnp.bfloat16).astype(jnp.float32)
        for p in _quantize_weights(layers, jnp.bfloat16):
            ref = _ref_block(ref, p, H)
        ref = jax.block_until_ready(ref)

    assert out.shape == (B, L, D)
    assert bool(jnp.all(jnp.isfinite(out)))
    if not jnp.allclose(out, ref, atol=3e-2, rtol=3e-2):
        raise AssertionError(
            f"Pallas output does not match JAX reference "
            f"(max abs err = {float(jnp.max(jnp.abs(out - ref)))})")
    print("KERNEL_OK")
</pallas_src>

<mosaic_0001>
module attributes {stable_mosaic.version = 11 : i64} {
  func.func @_encoder_stack_kernel(%arg0: i32, %arg1: i32, %arg2: memref<2x8x32xbf16, #tpu.memory_space<vmem>>, %arg3: memref<1x32x96xbf16, #tpu.memory_space<vmem>>, %arg4: memref<1x32x32xbf16, #tpu.memory_space<vmem>>, %arg5: memref<1x32x64xbf16, #tpu.memory_space<vmem>>, %arg6: memref<1x64x32xbf16, #tpu.memory_space<vmem>>, %arg7: memref<1x9x32xf32, #tpu.memory_space<vmem>>, %arg8: memref<1x1x64xf32, #tpu.memory_space<vmem>>, %arg9: memref<2x8x32xf32, #tpu.memory_space<vmem>>, %arg10: memref<16x32xf32, #tpu.memory_space<vmem>>, %arg11: memref<16x32xbf16, #tpu.memory_space<vmem>>) attributes {dimension_semantics = [#tpu.dimension_semantics<parallel>, #tpu.dimension_semantics<arbitrary>], iteration_bounds = array<i64: 1, 2>, scalar_prefetch = 0 : i64, scratch_operands = 2 : i64, tpu.core_type = #tpu.core_type<tc>, window_params = [{transform_indices = @transform_0, window_bounds = array<i64: 2, 8, 32>}, {transform_indices = @transform_1, window_bounds = array<i64: 1, 32, 96>}, {transform_indices = @transform_2, window_bounds = array<i64: 1, 32, 32>}, {transform_indices = @transform_3, window_bounds = array<i64: 1, 32, 64>}, {transform_indices = @transform_4, window_bounds = array<i64: 1, 64, 32>}, {transform_indices = @transform_5, window_bounds = array<i64: 1, 9, 32>}, {transform_indices = @transform_6, window_bounds = array<i64: 1, 1, 64>}, {transform_indices = @transform_7, window_bounds = array<i64: 2, 8, 32>}]} {
    %c0_i32 = arith.constant 0 : i32
    %0 = arith.cmpi eq, %arg1, %c0_i32 : i32
    %1 = arith.extui %0 : i1 to i32
    %c0_i32_0 = arith.constant 0 : i32
    %2 = arith.cmpi ne, %1, %c0_i32_0 : i32
    scf.if %2 {
      %c0_52 = arith.constant 0 : index
      %c0_53 = arith.constant 0 : index
      %c0_54 = arith.constant 0 : index
      %150 = vector.load %arg2[%c0_52, %c0_53, %c0_54] : memref<2x8x32xbf16, #tpu.memory_space<vmem>>, vector<2x8x32xbf16>
      %151 = vector.shape_cast %150 : vector<2x8x32xbf16> to vector<16x32xbf16>
      %152 = arith.extf %151 : vector<16x32xbf16> to vector<16x32xf32>
      %c0_55 = arith.constant 0 : index
      %c0_56 = arith.constant 0 : index
      %153 = vector.load %arg10[%c0_55, %c0_56] : memref<16x32xf32, #tpu.memory_space<vmem>>, vector<16x32xf32>
      tpu.vector_store %arg10[%c0_55, %c0_56], %152 {strides = array<i32>} : memref<16x32xf32, #tpu.memory_space<vmem>>, vector<16x32xf32>,
    } else {
    }
    %c0 = arith.constant 0 : index
    %c0_1 = arith.constant 0 : index
    %3 = vector.load %arg10[%c0, %c0_1] : memref<16x32xf32, #tpu.memory_space<vmem>>, vector<16x32xf32>
    %c0_2 = arith.constant 0 : index
    %c0_3 = arith.constant 0 : index
    %c0_4 = arith.constant 0 : index
    %4 = vector.load %arg7[%c0_2, %c0_3, %c0_4] : memref<1x9x32xf32, #tpu.memory_space<vmem>>, vector<1x9x32xf32>
    %5 = vector.shape_cast %4 : vector<1x9x32xf32> to vector<9x32xf32>
    %6 = vector.extract_strided_slice %5 {offsets = [0, 0], sizes = [1, 32], strides = [1, 1]} : vector<9x32xf32> to vector<1x32xf32>
    %7 = vector.extract_strided_slice %5 {offsets = [1, 0], sizes = [1, 32], strides = [1, 1]} : vector<9x32xf32> to vector<1x32xf32>
    %8 = vector.extract_strided_slice %5 {offsets = [2, 0], sizes = [1, 32], strides = [1, 1]} : vector<9x32xf32> to vector<1x32xf32>
    %9 = vector.extract_strided_slice %5 {offsets = [3, 0], sizes = [1, 32], strides = [1, 1]} : vector<9x32xf32> to vector<1x32xf32>
    %10 = vector.extract_strided_slice %5 {offsets = [4, 0], sizes = [1, 32], strides = [1, 1]} : vector<9x32xf32> to vector<1x32xf32>
    %11 = vector.extract_strided_slice %5 {offsets = [5, 0], sizes = [1, 32], strides = [1, 1]} : vector<9x32xf32> to vector<1x32xf32>
    %12 = vector.extract_strided_slice %5 {offsets = [6, 0], sizes = [1, 32], strides = [1, 1]} : vector<9x32xf32> to vector<1x32xf32>
    %13 = vector.extract_strided_slice %5 {offsets = [7, 0], sizes = [1, 32], strides = [1, 1]} : vector<9x32xf32> to vector<1x32xf32>
    %14 = vector.extract_strided_slice %5 {offsets = [8, 0], sizes = [1, 32], strides = [1, 1]} : vector<9x32xf32> to vector<1x32xf32>
    %15 = arith.truncf %3 : vector<16x32xf32> to vector<16x32xbf16>
    %c0_5 = arith.constant 0 : index
    %c0_6 = arith.constant 0 : index
    %c0_7 = arith.constant 0 : index
    %16 = vector.load %arg3[%c0_5, %c0_6, %c0_7] : memref<1x32x96xbf16, #tpu.memory_space<vmem>>, vector<1x32x96xbf16>
    %17 = vector.shape_cast %16 : vector<1x32x96xbf16> to vector<32x96xbf16>
    %cst = arith.constant dense<0.000000e+00> : vector<16x96xf32>
    %18 = tpu.matmul %15, %17, %cst {dimension_numbers = #tpu.dot_dimension_numbers<[1], [0], [0], [1], [0, 0, 1, 1], [], []>} : vector<16x32xbf16>, vector<32x96xbf16>, vector<16x96xf32> -> vector<16x96xf32>
    %19 = vector.extract_strided_slice %18 {offsets = [0, 0], sizes = [16, 32], strides = [1, 1]} : vector<16x96xf32> to vector<16x32xf32>
    %20 = vector.broadcast %6 : vector<1x32xf32> to vector<16x32xf32>
    %21 = arith.addf %19, %20 : vector<16x32xf32>
    %22 = arith.truncf %21 : vector<16x32xf32> to vector<16x32xbf16>
    %23 = vector.extract_strided_slice %18 {offsets = [0, 32], sizes = [16, 32], strides = [1, 1]} : vector<16x96xf32> to vector<16x32xf32>
    %24 = vector.broadcast %7 : vector<1x32xf32> to vector<16x32xf32>
    %25 = arith.addf %23, %24 : vector<16x32xf32>
    %26 = arith.truncf %25 : vector<16x32xf32> to vector<16x32xbf16>
    %27 = vector.extract_strided_slice %18 {offsets = [0, 64], sizes = [16, 32], strides = [1, 1]} : vector<16x96xf32> to vector<16x32xf32>
    %28 = vector.broadcast %8 : vector<1x32xf32> to vector<16x32xf32>
    %29 = arith.addf %27, %28 : vector<16x32xf32>
    %30 = arith.truncf %29 : vector<16x32xf32> to vector<16x32xbf16>
    %31 = vector.extract_strided_slice %22 {offsets = [0, 0], sizes = [16, 16], strides = [1, 1]} : vector<16x32xbf16> to vector<16x16xbf16>
    %32 = vector.shape_cast %31 : vector<16x16xbf16> to vector<2x8x16xbf16>
    %33 = vector.extract_strided_slice %26 {offsets = [0, 0], sizes = [16, 16], strides = [1, 1]} : vector<16x32xbf16> to vector<16x16xbf16>
    %34 = vector.shape_cast %33 : vector<16x16xbf16> to vector<2x8x16xbf16>
    %35 = vector.extract_strided_slice %30 {offsets = [0, 0], sizes = [16, 16], strides = [1, 1]} : vector<16x32xbf16> to vector<16x16xbf16>
    %36 = vector.shape_cast %35 : vector<16x16xbf16> to vector<2x8x16xbf16>
    "tpu.trace_start"() <{level = 10 : i32, message = "bqd,bkd->bqk"}> : () -> ()
    %cst_8 = arith.constant dense<0.000000e+00> : vector<2x8x8xf32>
    %37 = tpu.matmul %32, %34, %cst_8 {dimension_numbers = #tpu.dot_dimension_numbers<[2], [2], [1], [1], [0, 0, 0, 1, 1, 1], [0], [0]>} : vector<2x8x16xbf16>, vector<2x8x16xbf16>, vector<2x8x8xf32> -> vector<2x8x8xf32>
    "tpu.trace_stop"() : () -> ()
    %cst_9 = arith.constant 2.500000e-01 : f32
    %38 = vector.broadcast %cst_9 : f32 to vector<2x8x8xf32>
    %39 = arith.mulf %37, %38 : vector<2x8x8xf32>
    %cst_10 = arith.constant dense<0xFF800000> : vector<2x8xf32>
    %40 = vector.multi_reduction <maximumf>, %39, %cst_10 [1] : vector<2x8x8xf32> to vector<2x8xf32>
    %41 = vector.shape_cast %40 : vector<2x8xf32> to vector<2x1x8xf32>
    %42 = vector.broadcast %41 : vector<2x1x8xf32> to vector<2x8x8xf32>
    %43 = arith.subf %39, %42 : vector<2x8x8xf32>
    %44 = math.exp %43 : vector<2x8x8xf32>
    %cst_11 = arith.constant dense<0.000000e+00> : vector<2x8xf32>
    %45 = vector.multi_reduction <add>, %44, %cst_11 [1] : vector<2x8x8xf32> to vector<2x8xf32>
    %46 = vector.shape_cast %45 : vector<2x8xf32> to vector<2x1x8xf32>
    %47 = tpu.reciprocal %46 {approx = true} : vector<2x1x8xf32> -> vector<2x1x8xf32>
    %48 = vector.broadcast %47 : vector<2x1x8xf32> to vector<2x8x8xf32>
    %49 = arith.mulf %44, %48 : vector<2x8x8xf32>
    %50 = arith.truncf %49 : vector<2x8x8xf32> to vector<2x8x8xbf16>
    "tpu.trace_start"() <{level = 10 : i32, message = "bqk,bkd->bqd"}> : () -> ()
    %cst_12 = arith.constant dense<0.000000e+00> : vector<2x8x16xf32>
    %51 = tpu.matmul %50, %36, %cst_12 {dimension_numbers = #tpu.dot_dimension_numbers<[2], [1], [1], [2], [0, 0, 0, 1, 1, 2], [0], [0]>} : vector<2x8x8xbf16>, vector<2x8x16xbf16>, vector<2x8x16xf32> -> vector<2x8x16xf32>
    "tpu.trace_stop"() : () -> ()
    %52 = vector.shape_cast %51 : vector<2x8x16xf32> to vector<16x16xf32>
    %53 = arith.truncf %52 : vector<16x16xf32> to vector<16x16xbf16>
    %c0_13 = arith.constant 0 : index
    %c0_14 = arith.constant 0 : index
    %54 = vector.load %arg11[%c0_13, %c0_14] : memref<16x32xbf16, #tpu.memory_space<vmem>>, vector<16x16xbf16>
    tpu.vector_store %arg11[%c0_13, %c0_14], %53 {strides = array<i32>} : memref<16x32xbf16, #tpu.memory_space<vmem>>, vector<16x16xbf16>,
    %55 = vector.extract_strided_slice %22 {offsets = [0, 16], sizes = [16, 16], strides = [1, 1]} : vector<16x32xbf16> to vector<16x16xbf16>
    %56 = vector.shape_cast %55 : vector<16x16xbf16> to vector<2x8x16xbf16>
    %57 = vector.extract_strided_slice %26 {offsets = [0, 16], sizes = [16, 16], strides = [1, 1]} : vector<16x32xbf16> to vector<16x16xbf16>
    %58 = vector.shape_cast %57 : vector<16x16xbf16> to vector<2x8x16xbf16>
    %59 = vector.extract_strided_slice %30 {offsets = [0, 16], sizes = [16, 16], strides = [1, 1]} : vector<16x32xbf16> to vector<16x16xbf16>
    %60 = vector.shape_cast %59 : vector<16x16xbf16> to vector<2x8x16xbf16>
    "tpu.trace_start"() <{level = 10 : i32, message = "bqd,bkd->bqk"}> : () -> ()
    %cst_15 = arith.constant dense<0.000000e+00> : vector<2x8x8xf32>
    %61 = tpu.matmul %56, %58, %cst_15 {dimension_numbers = #tpu.dot_dimension_numbers<[2], [2], [1], [1], [0, 0, 0, 1, 1, 1], [0], [0]>} : vector<2x8x16xbf16>, vector<2x8x16xbf16>, vector<2x8x8xf32> -> vector<2x8x8xf32>
    "tpu.trace_stop"() : () -> ()
    %cst_16 = arith.constant 2.500000e-01 : f32
    %62 = vector.broadcast %cst_16 : f32 to vector<2x8x8xf32>
    %63 = arith.mulf %61, %62 : vector<2x8x8xf32>
    %cst_17 = arith.constant dense<0xFF800000> : vector<2x8xf32>
    %64 = vector.multi_reduction <maximumf>, %63, %cst_17 [1] : vector<2x8x8xf32> to vector<2x8xf32>
    %65 = vector.shape_cast %64 : vector<2x8xf32> to vector<2x1x8xf32>
    %66 = vector.broadcast %65 : vector<2x1x8xf32> to vector<2x8x8xf32>
    %67 = arith.subf %63, %66 : vector<2x8x8xf32>
    %68 = math.exp %67 : vector<2x8x8xf32>
    %cst_18 = arith.constant dense<0.000000e+00> : vector<2x8xf32>
    %69 = vector.multi_reduction <add>, %68, %cst_18 [1] : vector<2x8x8xf32> to vector<2x8xf32>
    %70 = vector.shape_cast %69 : vector<2x8xf32> to vector<2x1x8xf32>
    %71 = tpu.reciprocal %70 {approx = true} : vector<2x1x8xf32> -> vector<2x1x8xf32>
    %72 = vector.broadcast %71 : vector<2x1x8xf32> to vector<2x8x8xf32>
    %73 = arith.mulf %68, %72 : vector<2x8x8xf32>
    %74 = arith.truncf %73 : vector<2x8x8xf32> to vector<2x8x8xbf16>
    "tpu.trace_start"() <{level = 10 : i32, message = "bqk,bkd->bqd"}> : () -> ()
    %cst_19 = arith.constant dense<0.000000e+00> : vector<2x8x16xf32>
    %75 = tpu.matmul %74, %60, %cst_19 {dimension_numbers = #tpu.dot_dimension_numbers<[2], [1], [1], [2], [0, 0, 0, 1, 1, 2], [0], [0]>} : vector<2x8x8xbf16>, vector<2x8x16xbf16>, vector<2x8x16xf32> -> vector<2x8x16xf32>
    "tpu.trace_stop"() : () -> ()
    %76 = vector.shape_cast %75 : vector<2x8x16xf32> to vector<16x16xf32>
    %77 = arith.truncf %76 : vector<16x16xf32> to vector<16x16xbf16>
    %c0_20 = arith.constant 0 : index
    %c16 = arith.constant 16 : index
    %78 = vector.load %arg11[%c0_20, %c16] : memref<16x32xbf16, #tpu.memory_space<vmem>>, vector<16x16xbf16>
    tpu.vector_store %arg11[%c0_20, %c16], %77 {strides = array<i32>} : memref<16x32xbf16, #tpu.memory_space<vmem>>, vector<16x16xbf16>,
    %c0_21 = arith.constant 0 : index
    %c0_22 = arith.constant 0 : index
    %79 = vector.load %arg11[%c0_21, %c0_22] : memref<16x32xbf16, #tpu.memory_space<vmem>>, vector<16x32xbf16>
    %c0_23 = arith.constant 0 : index
    %c0_24 = arith.constant 0 : index
    %c0_25 = arith.constant 0 : index
    %80 = vector.load %arg4[%c0_23, %c0_24, %c0_25] : memref<1x32x32xbf16, #tpu.memory_space<vmem>>, vector<1x32x32xbf16>
    %81 = vector.shape_cast %80 : vector<1x32x32xbf16> to vector<32x32xbf16>
    %cst_26 = arith.constant dense<0.000000e+00> : vector<16x32xf32>
    %82 = tpu.matmul %79, %81, %cst_26 {dimension_numbers = #tpu.dot_dimension_numbers<[1], [0], [0], [1], [0, 0, 1, 1], [], []>} : vector<16x32xbf16>, vector<32x32xbf16>, vector<16x32xf32> -> vector<16x32xf32>
    %83 = vector.broadcast %9 : vector<1x32xf32> to vector<16x32xf32>
    %84 = arith.addf %82, %83 : vector<16x32xf32>
    %cst_27 = arith.constant dense<0.000000e+00> : vector<16xf32>
    %85 = vector.multi_reduction <add>, %84, %cst_27 [1] : vector<16x32xf32> to vector<16xf32>
    %86 = vector.shape_cast %85 : vector<16xf32> to vector<16x1xf32>
    %cst_28 = arith.constant 3.200000e+01 : f32
    %87 = vector.broadcast %cst_28 : f32 to vector<16x1xf32>
    %88 = arith.divf %86, %87 : vector<16x1xf32>
    %89 = vector.broadcast %88 : vector<16x1xf32> to vector<16x32xf32>
    %90 = arith.subf %84, %89 : vector<16x32xf32>
    %91 = arith.mulf %90, %90 : vector<16x32xf32>
    %cst_29 = arith.constant dense<0.000000e+00> : vector<16xf32>
    %92 = vector.multi_reduction <add>, %91, %cst_29 [1] : vector<16x32xf32> to vector<16xf32>
    %93 = vector.shape_cast %92 : vector<16xf32> to vector<16x1xf32>
    %cst_30 = arith.constant 3.200000e+01 : f32
    %94 = vector.broadcast %cst_30 : f32 to vector<16x1xf32>
    %95 = arith.divf %93, %94 : vector<16x1xf32>
    %96 = vector.broadcast %88 : vector<16x1xf32> to vector<16x32xf32>
    %97 = arith.subf %84, %96 : vector<16x32xf32>
    %cst_31 = arith.constant 9.99999974E-6 : f32
    %98 = vector.broadcast %cst_31 : f32 to vector<16x1xf32>
    %99 = arith.addf %95, %98 : vector<16x1xf32>
    %100 = math.rsqrt %99 : vector<16x1xf32>
    %101 = vector.broadcast %100 : vector<16x1xf32> to vector<16x32xf32>
    %102 = arith.mulf %97, %101 : vector<16x32xf32>
    %103 = vector.broadcast %11 : vector<1x32xf32> to vector<16x32xf32>
    %104 = arith.mulf %102, %103 : vector<16x32xf32>
    %105 = vector.broadcast %12 : vector<1x32xf32> to vector<16x32xf32>
    %106 = arith.addf %104, %105 : vector<16x32xf32>
    %107 = arith.truncf %106 : vector<16x32xf32> to vector<16x32xbf16>
    %c0_32 = arith.constant 0 : index
    %c0_33 = arith.constant 0 : index
    %c0_34 = arith.constant 0 : index
    %108 = vector.load %arg5[%c0_32, %c0_33, %c0_34] : memref<1x32x64xbf16, #tpu.memory_space<vmem>>, vector<1x32x64xbf16>
    %109 = vector.shape_cast %108 : vector<1x32x64xbf16> to vector<32x64xbf16>
    %cst_35 = arith.constant dense<0.000000e+00> : vector<16x64xf32>
    %110 = tpu.matmul %107, %109, %cst_35 {dimension_numbers = #tpu.dot_dimension_numbers<[1], [0], [0], [1], [0, 0, 1, 1], [], []>} : vector<16x32xbf16>, vector<32x64xbf16>, vector<16x64xf32> -> vector<16x64xf32>
    %c0_36 = arith.constant 0 : index
    %c0_37 = arith.constant 0 : index
    %c0_38 = arith.constant 0 : index
    %111 = vector.load %arg8[%c0_36, %c0_37, %c0_38] : memref<1x1x64xf32, #tpu.memory_space<vmem>>, vector<1x1x64xf32>
    %112 = vector.shape_cast %111 : vector<1x1x64xf32> to vector<1x64xf32>
    %113 = vector.broadcast %112 : vector<1x64xf32> to vector<16x64xf32>
    %114 = arith.addf %110, %113 : vector<16x64xf32>
    %cst_39 = arith.constant 0.000000e+00 : f32
    %115 = vector.broadcast %cst_39 : f32 to vector<16x64xf32>
    %116 = arith.maximumf %114, %115 : vector<16x64xf32>
    %117 = arith.truncf %116 : vector<16x64xf32> to vector<16x64xbf16>
    %c0_40 = arith.constant 0 : index
    %c0_41 = arith.constant 0 : index
    %c0_42 = arith.constant 0 : index
    %118 = vector.load %arg6[%c0_40, %c0_41, %c0_42] : memref<1x64x32xbf16, #tpu.memory_space<vmem>>, vector<1x64x32xbf16>
    %119 = vector.shape_cast %118 : vector<1x64x32xbf16> to vector<64x32xbf16>
    %cst_43 = arith.constant dense<0.000000e+00> : vector<16x32xf32>
    %120 = tpu.matmul %117, %119, %cst_43 {dimension_numbers = #tpu.dot_dimension_numbers<[1], [0], [0], [1], [0, 0, 1, 1], [], []>} : vector<16x64xbf16>, vector<64x32xbf16>, vector<16x32xf32> -> vector<16x32xf32>
    %121 = vector.broadcast %10 : vector<1x32xf32> to vector<16x32xf32>
    %122 = arith.addf %120, %121 : vector<16x32xf32>
    %123 = arith.addf %106, %122 : vector<16x32xf32>
    %cst_44 = arith.constant dense<0.000000e+00> : vector<16xf32>
    %124 = vector.multi_reduction <add>, %123, %cst_44 [1] : vector<16x32xf32> to vector<16xf32>
    %125 = vector.shape_cast %124 : vector<16xf32> to vector<16x1xf32>
    %cst_45 = arith.constant 3.200000e+01 : f32
    %126 = vector.broadcast %cst_45 : f32 to vector<16x1xf32>
    %127 = arith.divf %125, %126 : vector<16x1xf32>
    %128 = vector.broadcast %127 : vector<16x1xf32> to vector<16x32xf32>
    %129 = arith.subf %123, %128 : vector<16x32xf32>
    %130 = arith.mulf %129, %129 : vector<16x32xf32>
    %cst_46 = arith.constant dense<0.000000e+00> : vector<16xf32>
    %131 = vector.multi_reduction <add>, %130, %cst_46 [1] : vector<16x32xf32> to vector<16xf32>
    %132 = vector.shape_cast %131 : vector<16xf32> to vector<16x1xf32>
    %cst_47 = arith.constant 3.200000e+01 : f32
    %133 = vector.broadcast %cst_47 : f32 to vector<16x1xf32>
    %134 = arith.divf %132, %133 : vector<16x1xf32>
    %135 = vector.broadcast %127 : vector<16x1xf32> to vector<16x32xf32>
    %136 = arith.subf %123, %135 : vector<16x32xf32>
    %cst_48 = arith.constant 9.99999974E-6 : f32
    %137 = vector.broadcast %cst_48 : f32 to vector<16x1xf32>
    %138 = arith.addf %134, %137 : vector<16x1xf32>
    %139 = math.rsqrt %138 : vector<16x1xf32>
    %140 = vector.broadcast %139 : vector<16x1xf32> to vector<16x32xf32>
    %141 = arith.mulf %136, %140 : vector<16x32xf32>
    %142 = vector.broadcast %13 : vector<1x32xf32> to vector<16x32xf32>
    %143 = arith.mulf %141, %142 : vector<16x32xf32>
    %144 = vector.broadcast %14 : vector<1x32xf32> to vector<16x32xf32>
    %145 = arith.addf %143, %144 : vector<16x32xf32>
    %c0_49 = arith.constant 0 : index
    %c0_50 = arith.constant 0 : index
    %146 = vector.load %arg10[%c0_49, %c0_50] : memref<16x32xf32, #tpu.memory_space<vmem>>, vector<16x32xf32>
    tpu.vector_store %arg10[%c0_49, %c0_50], %145 {strides = array<i32>} : memref<16x32xf32, #tpu.memory_space<vmem>>, vector<16x32xf32>,
    %c1_i32 = arith.constant 1 : i32
    %147 = arith.cmpi eq, %arg1, %c1_i32 : i32
    %148 = arith.extui %147 : i1 to i32
    %c0_i32_51 = arith.constant 0 : i32
    %149 = arith.cmpi ne, %148, %c0_i32_51 : i32
    scf.if %149 {
      %150 = vector.shape_cast %145 : vector<16x32xf32> to vector<2x8x32xf32>
      %c0_52 = arith.constant 0 : index
      %c0_53 = arith.constant 0 : index
      %c0_54 = arith.constant 0 : index
      %151 = vector.load %arg9[%c0_52, %c0_53, %c0_54] : memref<2x8x32xf32, #tpu.memory_space<vmem>>, vector<2x8x32xf32>
      tpu.vector_store %arg9[%c0_52, %c0_53, %c0_54], %150 {strides = array<i32>} : memref<2x8x32xf32, #tpu.memory_space<vmem>>, vector<2x8x32xf32>,
    } else {
    }
    return
  }
  func.func @transform_0(%arg0: i32, %arg1: i32) -> (i32, i32, i32) {
    %c0_i32 = arith.constant 0 : i32
    %c0_i32_0 = arith.constant 0 : i32
    %c0_i32_1 = arith.constant 0 : i32
    return %arg0, %c0_i32, %c0_i32_0 : i32, i32, i32
  }
  func.func @transform_1(%arg0: i32, %arg1: i32) -> (i32, i32, i32) {
    %c0_i32 = arith.constant 0 : i32
    %c0_i32_0 = arith.constant 0 : i32
    %c0_i32_1 = arith.constant 0 : i32
    return %arg1, %c0_i32, %c0_i32_0 : i32, i32, i32
  }
  func.func @transform_2(%arg0: i32, %arg1: i32) -> (i32, i32, i32) {
    %c0_i32 = arith.constant 0 : i32
    %c0_i32_0 = arith.constant 0 : i32
    %c0_i32_1 = arith.constant 0 : i32
    return %arg1, %c0_i32, %c0_i32_0 : i32, i32, i32
  }
  func.func @transform_3(%arg0: i32, %arg1: i32) -> (i32, i32, i32) {
    %c0_i32 = arith.constant 0 : i32
    %c0_i32_0 = arith.constant 0 : i32
    %c0_i32_1 = arith.constant 0 : i32
    return %arg1, %c0_i32, %c0_i32_0 : i32, i32, i32
  }
  func.func @transform_4(%arg0: i32, %arg1: i32) -> (i32, i32, i32) {
    %c0_i32 = arith.constant 0 : i32
    %c0_i32_0 = arith.constant 0 : i32
    %c0_i32_1 = arith.constant 0 : i32
    return %arg1, %c0_i32, %c0_i32_0 : i32, i32, i32
  }
  func.func @transform_5(%arg0: i32, %arg1: i32) -> (i32, i32, i32) {
    %c0_i32 = arith.constant 0 : i32
    %c0_i32_0 = arith.constant 0 : i32
    %c0_i32_1 = arith.constant 0 : i32
    return %arg1, %c0_i32, %c0_i32_0 : i32, i32, i32
  }
  func.func @transform_6(%arg0: i32, %arg1: i32) -> (i32, i32, i32) {
    %c0_i32 = arith.constant 0 : i32
    %c0_i32_0 = arith.constant 0 : i32
    %c0_i32_1 = arith.constant 0 : i32
    return %arg1, %c0_i32, %c0_i32_0 : i32, i32, i32
  }
  func.func @transform_7(%arg0: i32, %arg1: i32) -> (i32, i32, i32) {
    %c0_i32 = arith.constant 0 : i32
    %c0_i32_0 = arith.constant 0 : i32
    %c0_i32_1 = arith.constant 0 : i32
    return %arg0, %c0_i32, %c0_i32_0 : i32, i32, i32
  }
}

</mosaic_0001>

<bundles_post_ra>
// kernel: tpu_custom_call.1
= control target key start
LH: loop header
LB: loop body
LE: loop exit
PB: predicated region body
PF: predicated region fallthrough
CT: control target
= control target key end

     0   :  { %12 = vsyncpa [#allocation5], 0  ;;  %s1836_s24 = smov 0   ;;  %s1838_s25 = smov 0   ;;  %s2037_s0 = inlined_call_operand.vmem [shape: bf16[2,8,32], index: 0, kind: input, shape index: {}]   ;;  %s2038_s1 = inlined_call_operand.vmem [shape: bf16[2,32,96], index: 1, kind: input, shape index: {}]   ;;  %s2039_s2 = inlined_call_operand.vmem [shape: bf16[2,32,32], index: 2, kind: input, shape index: {}]   ;;  %s2040_s3 = inlined_call_operand.vmem [shape: bf16[2,32,64], index: 3, kind: input, shape index: {}]   ;;  %s2041_s4 = inlined_call_operand.vmem [shape: bf16[2,64,32], index: 4, kind: input, shape index: {}]   ;;  %s2042_s5 = inlined_call_operand.vmem [shape: f32[2,9,32], index: 5, kind: input, shape index: {}]   ;;  %s2043_s6 = inlined_call_operand.vmem [shape: f32[2,1,64], index: 6, kind: input, shape index: {}]   ;;  %s2044_s7 = inlined_call_operand.hbm [shape: f32[2,8,32], index: 7, kind: output, shape index: {}]  }
   0x1   :  { %s1840_s26 = smov 0  }
   0x2 LB: > { %s1466_s27 = sadd.s32 4294967295, %s1782_s26   ;;  %s27_s28 = sadd.s32 1, %s1778_s25  ;;  %s1782_s26 = sphi %s1840_s26, %s18_s26   ;;  %s1778_s25 = sphi %s1838_s25, %s2047_s25   ;;  %s1774_s24 = sphi %s1836_s24, %s2046_s24  }
   0x3   : > { %p28_p0 = scmp.ge.s32.totalorder %s27_s28, 2  ;;  %p1470_p1 = scmp.ge.s32.totalorder %s1782_s26, 1 }
   0x4   : > { %p309_p2 = scmp.lt.s32.totalorder %s1782_s26, 3 }
   0x5   : > { %s2049_s28 = smov (%p28_p0, %s27_s28), 0 }
   0x6   : > { %p310_p3 = pnand %p1470_p1, %p309_p2 }
   0x7   : > { %p370_p4 = scmp.lt.s32.totalorder (!%p310_p3), %s1774_s24, 1  ;;  %p1481_p5 = scmp.ne.s32.totalorder (!%p310_p3), %s1774_s24, 0 }
   0x8   : > { %313 = sbr.rel (%p310_p3) target bundleno = 2436 (0x984), region = 48 }
   0xd   : > { %s1859_s29 = scalar_select %p370_p4, %s1774_s24, 1 }
   0xe   : > { %403 = sbr.rel (%p1481_p5) target bundleno = 23 (0x17), region = 52 }
   0xf   : > { %s1522_s30 = sshll.u32 %s1859_s29, 4  ;;  %s1525_s8 = sshll.u32 %s1859_s29, 5 }
  0x10   : > { %s374_s11 = scalar_lea.vmem %s2038_s1, %s1522_s30  ;;  %s1869_s14 = scalar_lea.vmem %s2039_s2, %s1522_s30 }
  0x11   : > { %s1874_s17 = scalar_lea.vmem %s2040_s3, %s1522_s30  ;;  %s1879_s20 = scalar_lea.vmem %s2041_s4, %s1525_s8 }
  0x12   : > { %s1884_s23 = scalar_lea.vmem %s2042_s5, %s1522_s30  ;;  %s397_s12 = scalar_lea.vmem %s2043_s6, %s1859_s29 }
  0x13   : > { %v1538_v0 = vld [vmem:[%s2037_s0] sm:$0xff]   ;;  %vm408_vm0 = vcmask 261120  }
  0x14   : > { %v1539_v1 = vunpack.c.l.bf16 %v1538_v0  ;;  %v1540_v2 = vunpack.c.h.bf16 %v1538_v0 }
  0x16   : > { %409 = vst.msk [vmem:[#allocation2] sm:$0xff] %vm408_vm0, %v1539_v1  ;;  %410 = vst.msk [vmem:[#allocation2 + $0x8] sm:$0xff] %vm408_vm0, %v1540_v2 }
  0x17 PF: > { %v1697_v3 = vld [vmem:[%s374_s11 + $0x8] sm:$0xff]   ;;  %v477_v4 = vlaneseq  ;;  %v1784_v5 = vmov 0.0   ;;  %v1698_v6 = vld [vmem:[%s374_s11] sm:$0xff]   ;;  %vm1785_vm1 = vmmov 0   ;;  %vm432_vm2 = vcmask 261120   ;;  %s1786_s30 = smov 32  }
  0x18   : > { %1571 = vmatprep.subr.bf16.mxu0 %v1784_v5  ;;  %1579 = vmatprep.subr.bf16.mxu1 %v1784_v5  ;;  %v1899_v9 = vld [vmem:[%s1884_s23] sm:$0xff]  ;;  %s1787_s8 = smov 96   ;;  %s1788_s11 = smov 64   ;;  %vm520_vm3 = vcmask 130048   ;;  %vm665_vm4 = vcmask 1043456   ;;  %vm618_vm5 = vcmask 64512  }
  0x19   : > { %1572 = vmatpush3.bf16.msra.mxu0 %v1697_v3  ;;  %1575 = vmatprep.mubr.msk.bf16.mxu0 %vm1785_vm1, %v1784_v5  ;;  %v1901_v10 = vshrl.u32 %v477_v4, 7  ;;  %s1789_s16 = smov 80   ;;  %s1790_s18 = smov 112   ;;  %vm766_vm6 = vcmask 125952   ;;  %vm1019_vm7 = vcmask 257152   ;;  %vm1239_vm8 = vcmask 523264  }
  0x1a   : > { %1573 = vmatprep.subr.bf16.mxu0 %v1784_v5  ;;  %1581 = vmatprep.mubr.msk.bf16.mxu1 %vm1785_vm1, %v1784_v5  ;;  %s1791_s19 = smov 48   ;;  %s1792_s21 = smov 16  }
  0x1b   : > { %v486_v11 = vsub.s32 1, %v1901_v10  ;;  %v497_v21 = vsub.s32 2, %v1901_v10  ;;  %v479_v25 = vsub.s32 0, %v1901_v10  ;;  %p1517_p6 = scmp.ne.s32.totalorder %s1774_s24, 1 }
  0x1d   : > { %v411_v7 = vld [vmem:[#allocation2] sm:$0xff]  ;;  %v412_v8 = vld [vmem:[#allocation2 + $0x8] sm:$0xff]  ;;  %1574 = vmatpush3.bf16.msra.mxu0 %v1698_v6  ;;  %v487_v13 = vrot.slane %v1899_v9, %v486_v11  ;;  %v498_v24 = vrot.slane %v1899_v9, %v497_v21  ;;  %v480_v26 = vrot.slane %v1899_v9, %v479_v25 }
  0x1e   : > { %v415_v12 = vpack.c.bf16 %v412_v8, %v411_v7  ;;  %1585 = vmatprep.subr.bf16.mxu0 %v1784_v5 }
  0x1f   : > { %489 = vrot.lane.b32.xlu0 %v487_v13, %s1786_s30 }
  0x20   : > { %1576 = vmatmul.mubr.msk.bf16.vlgmr.msra.gmra.mxu0 %vm432_vm2, %v415_v12 }
  0x21   : > { %1587 = vmatprep.mubr.msk.bf16.mxu0 %vm1785_vm1, %v1784_v5 }
  0x91   : > { %v490_v14 = vpop.permute.xlu0 %489 }
  0xe0   : > { %v470_v15 = vpop.f32.mrf.mxu0 }
  0xe1   : > { %v492_v16 = vadd.f32 %v490_v14, %v470_v15  ;;  %v481_v29 = vadd.f32 %v480_v26, %v470_v15 }
  0xe2   : > { %v1577_v17 = vpop.f32.mrf.mxu0 }
  0xe3   : > { %v1529_v18 = vpack.c.bf16 %v492_v16, %v492_v16  ;;  %v1527_v32 = vpack.c.bf16 %v481_v29, %v481_v29 }
  0xe4   : > { %v473_v19 = vpop.f32.mrf.mxu0 }
  0xe5   : > { %518 = vrot.lane.b32.xlu0 %v1529_v18, %s1787_s8  ;;  %v493_v20 = vadd.f32 %v490_v14, %v473_v19  ;;  %v482_v33 = vadd.f32 %v480_v26, %v473_v19 }
  0xe6   : > { %v1578_v22 = vpop.f32.mrf.mxu0 }
  0xe7   : > { %v1530_v23 = vpack.c.bf16 %v493_v20, %v493_v20  ;;  %v1528_v39 = vpack.c.bf16 %v482_v33, %v482_v33 }
  0xe9   : > { %568 = vrot.lane.b32.xlu1 %v1530_v23, %s1787_s8 }
  0xed   : > { %500 = vrot.lane.b32.xlu1 %v498_v24, %s1788_s11 }
 0x157   : > { %v519_v27 = vpop.permute.xlu0 %518 }
 0x158   : > { %v525_v28 = vsel %vm520_vm3, %v519_v27, 0 }
 0x159   : > { %1580 = vmatpush3.bf16.xpose.msra.mxu1 %v525_v28 }
 0x15a   : > { %1591 = vmatprep.subr.bf16.mxu1 %v1784_v5 }
 0x15b   : > { %v569_v30 = vpop.permute.xlu1 %568 }
 0x15c   : > { %v574_v31 = vsel %vm520_vm3, %v569_v30, 0 }
 0x15d   : > { %1586 = vmatpush3.bf16.xpose.msra.mxu0 %v574_v31 }
 0x15e   : > { %1597 = vmatprep.subr.bf16.mxu0 %v1784_v5 }
 0x15f   : > { %v501_v34 = vpop.permute.xlu1 %500 }
 0x160   : > { %v503_v35 = vadd.f32 %v501_v34, %v470_v15  ;;  %v504_v36 = vadd.f32 %v501_v34, %v473_v19  ;;  %1582 = vmatmul.mubr.msk.bf16.vlgmr.msra.gmra.mxu1 %vm520_vm3, %v1527_v32 }
 0x161   : > { %1593 = vmatprep.mubr.msk.bf16.mxu1 %vm1785_vm1, %v1784_v5 }
 0x162   : > { %v1531_v37 = vpack.c.bf16 %v503_v35, %v503_v35  ;;  %v1532_v38 = vpack.c.bf16 %v504_v36, %v504_v36 }
 0x164   : > { %710 = vrot.lane.b32.xlu1 %v1532_v38, %s1788_s11  ;;  %660 = vrot.lane.b32.xlu0 %v1531_v37, %s1788_s11 }
 0x165   : > { %1588 = vmatmul.mubr.msk.bf16.vlgmr.msra.gmra.mxu0 %vm520_vm3, %v1528_v39 }
 0x166   : > { %1599 = vmatprep.mubr.msk.bf16.mxu0 %vm1785_vm1, %v1784_v5 }
 0x168   : > { %821 = vrot.lane.b32.xlu1 %v1530_v23, %s1789_s16  ;;  %771 = vrot.lane.b32.xlu0 %v1529_v18, %s1789_s16 }
 0x16c   : > { %769 = vrot.lane.b32.xlu0 %v1527_v32, %s1790_s18  ;;  %819 = vrot.lane.b32.xlu1 %v1528_v39, %s1790_s18 }
 0x170   : > { %911 = vrot.lane.b32.xlu0 %v1531_v37, %s1791_s19  ;;  %959 = vrot.lane.b32.xlu1 %v1532_v38, %s1791_s19 }
 0x1d6   : > { %v711_v40 = vpop.permute.xlu1 %710  ;;  %v661_v41 = vpop.permute.xlu0 %660 }
 0x1d7   : > { %v716_v42 = vsel %vm665_vm4, %v711_v40, 0  ;;  %v667_v43 = vsel %vm665_vm4, %v661_v41, 0 }
 0x1d8   : > { %1592 = vmatpush3.bf16.msra.mxu1 %v667_v43  ;;  %1598 = vmatpush3.bf16.msra.mxu0 %v716_v42 }
 0x1d9   : > { %1603 = vmatprep.subr.bf16.mxu1 %v1784_v5  ;;  %1609 = vmatprep.subr.bf16.mxu0 %v1784_v5 }
 0x1da   : > { %v772_v27 = vpop.permute.xlu0 %771  ;;  %v822_v30 = vpop.permute.xlu1 %821 }
 0x1db   : > { %v777_v34 = vsel %vm520_vm3, %v772_v27, 0  ;;  %v827_v38 = vsel %vm520_vm3, %v822_v30, 0 }
 0x1de   : > { %v770_v32 = vpop.permute.xlu0 %769  ;;  %v820_v37 = vpop.permute.xlu1 %819 }
 0x1e2   : > { %v912_v39 = vpop.permute.xlu0 %911  ;;  %v960_v41 = vpop.permute.xlu1 %959 }
 0x1e3   : > { %v917_v40 = vsel %vm665_vm4, %v912_v39, 0  ;;  %v965_v42 = vsel %vm665_vm4, %v960_v41, 0 }
 0x220   : > { %v561_v44 = vpop.f32.mrf.mxu1 }
 0x221   : > { %v616_v45 = vmul.f32 0.25, %v561_v44 }
 0x222   : > { %v1583_v46 = vpop.f32.mrf.mxu1 }
 0x223   : > { %v619_v47 = vsel %vm618_vm5, %v616_v45, -inf }
 0x224   : > { %v620_v48 = vrot.slane %v619_v47, 4  ;;  %v564_v49 = vpop.f32.mrf.mxu1 }
 0x225   : > { %v610_v50 = vpop.f32.mrf.mxu0 }
 0x226   : > { %v621_v51 = vmax.f32 %v619_v47, %v620_v48  ;;  %v617_v52 = vmul.f32 0.25, %v610_v50  ;;  %v1584_v53 = vpop.f32.mrf.mxu1 }
 0x227   : > { %v1589_v54 = vpop.f32.mrf.mxu0 }
 0x228   : > { %v622_v55 = vrot.slane %v621_v51, 2  ;;  %v626_v56 = vsel %vm618_vm5, %v617_v52, -inf }
 0x229   : > { %v627_v57 = vrot.slane %v626_v56, 4  ;;  %v613_v58 = vpop.f32.mrf.mxu0 }
 0x22a   : > { %v623_v59 = vmax.f32 %v621_v51, %v622_v55 }
 0x22b   : > { %v628_v60 = vmax.f32 %v626_v56, %v627_v57  ;;  %v1590_v61 = vpop.f32.mrf.mxu0 }
 0x22c   : > { %v624_v62 = vrot.slane %v623_v59, 1 }
 0x22d   : > { %v629_v63 = vrot.slane %v628_v60, 2 }
 0x22e   : > { %v625_v0 = vmax.f32 %v623_v59, %v624_v62 }
 0x22f   : > { %v630_v1 = vmax.f32 %v628_v60, %v629_v63 }
 0x230   : > { %v633_v2 = vsub.f32 %v616_v45, %v625_v0 }
 0x231   : > { %v631_v3 = vrot.slane %v630_v1, 1 }
 0x232   : > { %v635_v4 = vmul.f32 1.442695, %v633_v2 }
 0x233   : > { %v632_v6 = vmax.f32 %v630_v1, %v631_v3 }
 0x234   : > { %1708 = vpow2.f32 %v635_v4 }
 0x235   : > { %v634_v7 = vsub.f32 %v617_v52, %v632_v6 }
 0x237   : > { %v637_v8 = vmul.f32 1.442695, %v634_v7 }
 0x239   : > { %1710 = vpow2.f32 %v637_v8 }
 0x241   : > { %v1709_v11 = vpop.eup %1708 }
 0x242   : > { %v639_v12 = vsel %vm618_vm5, %v1709_v11, 0.0 }
 0x243   : > { %v640_v13 = vrot.slane %v639_v12, 4 }
 0x245   : > { %v641_v14 = vadd.f32 %v640_v13, %v639_v12 }
 0x246   : > { %v1711_v15 = vpop.eup %1710 }
 0x247   : > { %v642_v16 = vrot.slane %v641_v14, 2  ;;  %v646_v17 = vsel %vm618_vm5, %v1711_v15, 0.0 }
 0x248   : > { %v647_v18 = vrot.slane %v646_v17, 4 }
 0x249   : > { %v643_v19 = vadd.f32 %v642_v16, %v641_v14 }
 0x24a   : > { %v648_v20 = vadd.f32 %v647_v18, %v646_v17 }
 0x24b   : > { %v644_v21 = vrot.slane %v643_v19, 1 }
 0x24c   : > { %v649_v22 = vrot.slane %v648_v20, 2 }
 0x24d   : > { %v645_v23 = vadd.f32 %v644_v21, %v643_v19 }
 0x24e   : > { %v650_v24 = vadd.f32 %v649_v22, %v648_v20 }
 0x24f   : > { %1712 = vrcp.f32 %v645_v23 }
 0x250   : > { %v651_v25 = vrot.slane %v650_v24, 1 }
 0x252   : > { %v652_v26 = vadd.f32 %v651_v25, %v650_v24 }
 0x254   : > { %1714 = vrcp.f32 %v652_v26 }
 0x25c   : > { %v1713_v28 = vpop.eup %1712 }
 0x25d   : > { %v655_v29 = vmul.f32 %v1713_v28, %v1709_v11 }
 0x25f   : > { %v657_v31 = vpack.c.bf16 %v655_v29, %v655_v29 }
 0x261   : > { %v1715_v33 = vpop.eup %1714  ;;  %1594 = vmatmul.mubr.msk.bf16.vlgmr.msra.gmra.mxu1 %vm618_vm5, %v657_v31 }
 0x262   : > { %1604 = vmatpush3.bf16.xpose.msra.mxu1 %v777_v34  ;;  %v656_v35 = vmul.f32 %v1715_v33, %v1711_v15  ;;  %1605 = vmatprep.mubr.msk.bf16.mxu1 %vm1785_vm1, %v1784_v5 }
 0x263   : > { %1615 = vmatprep.subr.bf16.mxu1 %v1784_v5 }
 0x264   : > { %v658_v36 = vpack.c.bf16 %v656_v35, %v656_v35 }
 0x266   : > { %1600 = vmatmul.mubr.msk.bf16.vlgmr.msra.gmra.mxu0 %vm618_vm5, %v658_v36 }
 0x267   : > { %1610 = vmatpush3.bf16.xpose.msra.mxu0 %v827_v38  ;;  %1611 = vmatprep.mubr.msk.bf16.mxu0 %vm1785_vm1, %v1784_v5 }
 0x268   : > { %1621 = vmatprep.subr.bf16.mxu0 %v1784_v5 }
 0x269   : > { %1606 = vmatmul.mubr.msk.bf16.vlgmr.msra.gmra.mxu1 %vm520_vm3, %v770_v32 }
 0x26a   : > { %1616 = vmatpush3.bf16.msra.mxu1 %v917_v40  ;;  %1617 = vmatprep.mubr.msk.bf16.mxu1 %vm1785_vm1, %v1784_v5 }
 0x26b   : > { %1627 = vmatprep.subr.bf16.mxu1 %v1784_v5 }
 0x26e   : > { %1612 = vmatmul.mubr.msk.bf16.vlgmr.msra.gmra.mxu0 %vm520_vm3, %v820_v37 }
 0x26f   : > { %1622 = vmatpush3.bf16.msra.mxu0 %v965_v42  ;;  %1623 = vmatprep.mubr.msk.bf16.mxu0 %vm1785_vm1, %v1784_v5  ;;  %v1699_v42 = vld [vmem:[%s1869_s14 + $0x8] sm:$0xff]  }
 0x270   : > { %1635 = vmatprep.subr.bf16.mxu0 %v1784_v5 }
 0x321   : > { %v703_v43 = vpop.f32.mrf.mxu1 }
 0x322   : > { %v1533_v44 = vpack.c.bf16 %v703_v43, %v703_v43  ;;  %v1700_v43 = vld [vmem:[%s1869_s14] sm:$0xff]  }
 0x323   : > { %v1595_v45 = vpop.f32.mrf.mxu1 }
 0x324   : > { %767 = vst.msk [vmem:[#allocation3] sm:$0xf] %vm766_vm6, %v1533_v44 }
 0x325   : > { %v706_v46 = vpop.f32.mrf.mxu1 }
 0x326   : > { %v752_v47 = vpop.f32.mrf.mxu0 }
 0x327   : > { %v1534_v48 = vpack.c.bf16 %v752_v47, %v752_v47  ;;  %v1596_v49 = vpop.f32.mrf.mxu1 }
 0x328   : > { %v1601_v50 = vpop.f32.mrf.mxu0 }
 0x329   : > { %768 = vst.msk [vmem:[#allocation3 + $0x4] sm:$0xf] %vm766_vm6, %v1534_v48  ;;  %v813_v51 = vpop.f32.mrf.mxu1 }
 0x32a   : > { %v755_v52 = vpop.f32.mrf.mxu0  ;;  %v869_v53 = vmul.f32 0.25, %v813_v51 }
 0x32b   : > { %v1607_v54 = vpop.f32.mrf.mxu1 }
 0x32c   : > { %v871_v55 = vsel %vm618_vm5, %v869_v53, -inf  ;;  %v1602_v56 = vpop.f32.mrf.mxu0 }
 0x32d   : > { %v872_v57 = vrot.slane %v871_v55, 4  ;;  %v816_v58 = vpop.f32.mrf.mxu1 }
 0x32e   : > { %v863_v59 = vpop.f32.mrf.mxu0 }
 0x32f   : > { %v873_v60 = vmax.f32 %v871_v55, %v872_v57  ;;  %v870_v61 = vmul.f32 0.25, %v863_v59  ;;  %v1608_v62 = vpop.f32.mrf.mxu1  ;;  %v1030_v57 = vsub.s32 3, %v1901_v10 }
 0x330   : > { %v1613_v63 = vpop.f32.mrf.mxu0 }
 0x331   : > { %v874_v0 = vrot.slane %v873_v60, 2  ;;  %v878_v1 = vsel %vm618_vm5, %v870_v61, -inf  ;;  %v1031_v58 = vrot.slane %v1899_v9, %v1030_v57 }
 0x332   : > { %v879_v2 = vrot.slane %v878_v1, 4  ;;  %v866_v3 = vpop.f32.mrf.mxu0 }
 0x333   : > { %v875_v4 = vmax.f32 %v873_v60, %v874_v0 }
 0x334   : > { %v880_v6 = vmax.f32 %v878_v1, %v879_v2  ;;  %v1614_v7 = vpop.f32.mrf.mxu0 }
 0x335   : > { %v876_v8 = vrot.slane %v875_v4, 1 }
 0x336   : > { %v881_v11 = vrot.slane %v880_v6, 2 }
 0x337   : > { %v877_v12 = vmax.f32 %v875_v4, %v876_v8 }
 0x338   : > { %v882_v13 = vmax.f32 %v880_v6, %v881_v11 }
 0x339   : > { %v885_v14 = vsub.f32 %v869_v53, %v877_v12 }
 0x33a   : > { %v883_v15 = vrot.slane %v882_v13, 1 }
 0x33b   : > { %v887_v16 = vmul.f32 1.442695, %v885_v14 }
 0x33c   : > { %v884_v17 = vmax.f32 %v882_v13, %v883_v15 }
 0x33d   : > { %1716 = vpow2.f32 %v887_v16  ;;  %v1702_v16 = vld [vmem:[%s1874_s17 + $0x8] sm:$0xff]  }
 0x33e   : > { %v886_v18 = vsub.f32 %v870_v61, %v884_v17  ;;  %v1703_v17 = vld [vmem:[%s1874_s17] sm:$0xff]  }
 0x340   : > { %v889_v19 = vmul.f32 1.442695, %v886_v18  ;;  %v1704_v18 = vld [vmem:[%s1879_s20 + $0x18] sm:$0xff]  }
 0x342   : > { %1718 = vpow2.f32 %v889_v19 }
 0x34a   : > { %v1717_v20 = vpop.eup %1716 }
 0x34b   : > { %v891_v21 = vsel %vm618_vm5, %v1717_v20, 0.0 }
 0x34c   : > { %v892_v22 = vrot.slane %v891_v21, 4 }
 0x34e   : > { %v893_v23 = vadd.f32 %v892_v22, %v891_v21 }
 0x34f   : > { %v1719_v24 = vpop.eup %1718 }
 0x350   : > { %v894_v25 = vrot.slane %v893_v23, 2  ;;  %v898_v26 = vsel %vm618_vm5, %v1719_v24, 0.0 }
 0x351   : > { %v899_v27 = vrot.slane %v898_v26, 4 }
 0x352   : > { %v895_v28 = vadd.f32 %v894_v25, %v893_v23  ;;  %v1122_v25 = vsub.s32 5, %v1901_v10 }
 0x353   : > { %v900_v29 = vadd.f32 %v899_v27, %v898_v26 }
 0x354   : > { %v896_v30 = vrot.slane %v895_v28, 1 }
 0x355   : > { %v901_v31 = vrot.slane %v900_v29, 2 }
 0x356   : > { %v897_v32 = vadd.f32 %v896_v30, %v895_v28  ;;  %v1123_v28 = vrot.slane %v1899_v9, %v1122_v25 }
 0x357   : > { %v902_v33 = vadd.f32 %v901_v31, %v900_v29  ;;  %v1128_v29 = vsub.s32 6, %v1901_v10 }
 0x358   : > { %1720 = vrcp.f32 %v897_v32 }
 0x359   : > { %v903_v34 = vrot.slane %v902_v33, 1 }
 0x35b   : > { %v904_v35 = vadd.f32 %v903_v34, %v902_v33  ;;  %v1129_v33 = vrot.slane %v1899_v9, %v1128_v29 }
 0x35d   : > { %1722 = vrcp.f32 %v904_v35 }
 0x365   : > { %v1721_v36 = vpop.eup %1720 }
 0x366   : > { %v907_v37 = vmul.f32 %v1721_v36, %v1717_v20 }
 0x368   : > { %v909_v38 = vpack.c.bf16 %v907_v37, %v907_v37 }
 0x36a   : > { %v1723_v39 = vpop.eup %1722  ;;  %1618 = vmatmul.mubr.msk.bf16.vlgmr.msra.gmra.mxu1 %vm618_vm5, %v909_v38  ;;  %v1705_v38 = vld [vmem:[%s1879_s20 + $0x10] sm:$0xff]  }
 0x36b   : > { %v908_v40 = vmul.f32 %v1723_v39, %v1719_v24  ;;  %1631 = vmatprep.mubr.msk.bf16.mxu1 %vm1785_vm1, %v1784_v5  ;;  %1628 = vmatpush3.bf16.msra.mxu1 %v1699_v42  ;;  %v1706_v39 = vld [vmem:[%s1879_s20 + $0x8] sm:$0xff]  }
 0x36c   : > { %1629 = vmatprep.subr.bf16.mxu1 %v1784_v5 }
 0x36d   : > { %v910_v41 = vpack.c.bf16 %v908_v40, %v908_v40  ;;  %v1707_v40 = vld [vmem:[%s1879_s20] sm:$0xff]  }
 0x36f   : > { %1624 = vmatmul.mubr.msk.bf16.vlgmr.msra.gmra.mxu0 %vm618_vm5, %v910_v41  ;;  %1630 = vmatpush3.bf16.msra.mxu1 %v1700_v43  ;;  %v1507_v41 = vld [vmem:[%s397_s12] ss:$0 sm:$0xff] }
 0x370   : > { %1639 = vmatprep.mubr.msk.bf16.mxu0 %vm1785_vm1, %v1784_v5  ;;  %1643 = vmatprep.subr.bf16.mxu1 %v1784_v5 }
 0x371   : > { %1636 = vmatpush3.bf16.msra.mxu0 %v1702_v16 }
 0x372   : > { %1637 = vmatprep.subr.bf16.mxu0 %v1784_v5 }
 0x375   : > { %1638 = vmatpush3.bf16.msra.mxu0 %v1703_v17  ;;  %v1314_v17 = vsub.s32 7, %v1901_v10 }
 0x42a   : > { %v953_v44 = vpop.f32.mrf.mxu1 }
 0x42b   : > { %v1535_v45 = vpack.c.bf16 %v953_v44, %v953_v44 }
 0x42c   : > { %v1619_v46 = vpop.f32.mrf.mxu1 }
 0x42d   : > { %1013 = vrot.lane.b32.xlu0 %v1535_v45, %s1792_s21 }
 0x42e   : > { %v956_v47 = vpop.f32.mrf.mxu1 }
 0x42f   : > { %v1001_v48 = vpop.f32.mrf.mxu0 }
 0x430   : > { %v1536_v49 = vpack.c.bf16 %v1001_v48, %v1001_v48  ;;  %v1620_v50 = vpop.f32.mrf.mxu1 }
 0x431   : > { %v1625_v51 = vpop.f32.mrf.mxu0 }
 0x432   : > { %1015 = vrot.lane.b32.xlu1 %v1536_v49, %s1792_s21 }
 0x433   : > { %v1004_v52 = vpop.f32.mrf.mxu0 }
 0x435   : > { %v1626_v53 = vpop.f32.mrf.mxu0 }
 0x49f   : > { %v1014_v54 = vpop.permute.xlu0 %1013 }
 0x4a0   : > { %1020 = vst.msk [vmem:[#allocation3] sm:$0xf] %vm1019_vm7, %v1014_v54 }
 0x4a4   : > { %v1016_v55 = vpop.permute.xlu1 %1015 }
 0x4a5   : > { %1021 = vst.msk [vmem:[#allocation3 + $0x4] sm:$0xf] %vm1019_vm7, %v1016_v55 }
 0x4ac   : > { %v1701_v56 = vld [vmem:[#allocation3] sm:$0xff]  }
 0x4ad   : > { %1632 = vmatmul.mubr.msk.bf16.vlgmr.msra.gmra.mxu1 %vm432_vm2, %v1701_v56 }
 0x4ae   : > { %1651 = vmatprep.mubr.msk.bf16.mxu1 %vm1785_vm1, %v1784_v5  ;;  %1644 = vmatpush3.bf16.msra.mxu1 %v1704_v18  ;;  %v1315_v18 = vrot.slane %v1899_v9, %v1314_v17 }
 0x4af   : > { %1645 = vmatprep.subr.bf16.mxu1 %v1784_v5 }
 0x4b2   : > { %1646 = vmatpush3.bf16.msra.mxu1 %v1705_v38 }
 0x4b3   : > { %1647 = vmatprep.subr.bf16.mxu1 %v1784_v5 }
 0x4b6   : > { %1648 = vmatpush3.bf16.msra.mxu1 %v1706_v39 }
 0x4b7   : > { %1649 = vmatprep.subr.bf16.mxu1 %v1784_v5  ;;  %v1213_v5 = vsub.s32 4, %v1901_v10 }
 0x4b9   : > { %v1214_v51 = vrot.slane %v1899_v9, %v1213_v5 }
 0x4ba   : > { %1650 = vmatpush3.bf16.msra.mxu1 %v1707_v40 }
 0x56d   : > { %v1086_v59 = vpop.f32.mrf.mxu1 }
 0x56e   : > { %v1087_v60 = vadd.f32 %v1086_v59, %v1031_v58 }
 0x56f   : > { %v1633_v61 = vpop.f32.mrf.mxu1 }
 0x570   : > { %v1093_v62 = vsel %vm432_vm2, %v1087_v60, 0.0 }
 0x571   : > { %1094 = vadd.xlane.f32.xlu0 %v1093_v62  ;;  %v1089_v63 = vpop.f32.mrf.mxu1 }
 0x572   : > { %v1090_v0 = vadd.f32 %v1089_v63, %v1031_v58 }
 0x573   : > { %v1634_v1 = vpop.f32.mrf.mxu1 }
 0x574   : > { %v1096_v2 = vsel %vm432_vm2, %v1090_v0, 0.0 }
 0x575   : > { %1097 = vadd.xlane.f32.xlu1 %v1096_v2 }
 0x5fa   : > { %v1095_v3 = vpop.xlane.xlu0 %1094 }
 0x5fb   : > { %v1100_v4 = vmul.f32 0.03125, %v1095_v3 }
 0x5fd   : > { %v1102_v6 = vsub.f32 %v1087_v60, %v1100_v4 }
 0x5fe   : > { %v1098_v7 = vpop.xlane.xlu1 %1097 }
 0x5ff   : > { %v1101_v8 = vmul.f32 0.03125, %v1098_v7  ;;  %v1104_v11 = vmul.f32 %v1102_v6, %v1102_v6 }
 0x601   : > { %v1103_v12 = vsub.f32 %v1090_v0, %v1101_v8  ;;  %v1106_v13 = vsel %vm432_vm2, %v1104_v11, 0.0 }
 0x602   : > { %1107 = vadd.xlane.f32.xlu0 %v1106_v13 }
 0x603   : > { %v1105_v14 = vmul.f32 %v1103_v12, %v1103_v12 }
 0x605   : > { %v1109_v15 = vsel %vm432_vm2, %v1105_v14, 0.0 }
 0x606   : > { %1110 = vadd.xlane.f32.xlu0 %v1109_v15 }
 0x68b   : > { %v1108_v19 = vpop.xlane.xlu0 %1107 }
 0x68c   : > { %v1112_v20 = vmul.f32 0.03125, %v1108_v19 }
 0x68e   : > { %v1114_v21 = vadd.f32 1e-05, %v1112_v20 }
 0x68f   : > { %v1111_v22 = vpop.xlane.xlu0 %1110 }
 0x690   : > { %1724 = vrsqrt.f32 %v1114_v21  ;;  %v1113_v23 = vmul.f32 0.03125, %v1111_v22  ;;  %v1516_v21 = vld [vmem:[%s1884_s23 + $0x8] ss:$0 sm:$0xff] }
 0x692   : > { %v1115_v24 = vadd.f32 1e-05, %v1113_v23 }
 0x694   : > { %1726 = vrsqrt.f32 %v1115_v24 }
 0x69d   : > { %v1725_v26 = vpop.eup %1724 }
 0x69e   : > { %v1118_v27 = vmul.f32 %v1725_v26, %v1102_v6 }
 0x6a0   : > { %v1124_v32 = vmul.f32 %v1123_v28, %v1118_v27 }
 0x6a1   : > { %v1727_v30 = vpop.eup %1726 }
 0x6a2   : > { %v1119_v31 = vmul.f32 %v1727_v30, %v1103_v12  ;;  %v1130_v35 = vadd.f32 %v1129_v33, %v1124_v32 }
 0x6a4   : > { %v1125_v34 = vmul.f32 %v1123_v28, %v1119_v31 }
 0x6a6   : > { %v1131_v36 = vadd.f32 %v1129_v33, %v1125_v34 }
 0x6a8   : > { %v1132_v37 = vpack.c.bf16 %v1131_v36, %v1130_v35 }
 0x6aa   : > { %1640 = vmatmul.mubr.msk.bf16.vlgmr.msra.gmra.mxu0 %vm432_vm2, %v1132_v37 }
 0x76a   : > { %v1193_v42 = vpop.f32.mrf.mxu0 }
 0x76b   : > { %v1194_v44 = vadd.f32 %v1507_v41, %v1193_v42 }
 0x76c   : > { %v1641_v43 = vpop.f32.mrf.mxu0 }
 0x76d   : > { %v1200_v48 = vmax.f32 %v1194_v44, 0.0 }
 0x76e   : > { %v1196_v45 = vpop.f32.mrf.mxu0 }
 0x76f   : > { %v1197_v46 = vadd.f32 %v1507_v41, %v1196_v45 }
 0x770   : > { %v1642_v47 = vpop.f32.mrf.mxu0 }
 0x771   : > { %v1201_v49 = vmax.f32 %v1197_v46, 0.0 }
 0x773   : > { %v1202_v50 = vpack.c.bf16 %v1201_v49, %v1200_v48 }
 0x775   : > { %1652 = vmatmul.mubr.msk.bf16.vlgmr.msra.gmra.mxu1 %vm1239_vm8, %v1202_v50 }
 0x835   : > { %v1277_v52 = vpop.f32.mrf.mxu1 }
 0x836   : > { %v1278_v53 = vadd.f32 %v1277_v52, %v1214_v51 }
 0x837   : > { %v1653_v54 = vpop.f32.mrf.mxu1 }
 0x838   : > { %v1284_v55 = vadd.f32 %v1278_v53, %v1130_v35 }
 0x839   : > { %v1280_v56 = vpop.f32.mrf.mxu1 }
 0x83a   : > { %v1281_v57 = vadd.f32 %v1280_v56, %v1214_v51  ;;  %v1286_v58 = vsel %vm432_vm2, %v1284_v55, 0.0 }
 0x83b   : > { %1287 = vadd.xlane.f32.xlu1 %v1286_v58  ;;  %v1654_v59 = vpop.f32.mrf.mxu1 }
 0x83c   : > { %v1285_v60 = vadd.f32 %v1281_v57, %v1131_v36 }
 0x83e   : > { %v1289_v61 = vsel %vm432_vm2, %v1285_v60, 0.0 }
 0x83f   : > { %1290 = vadd.xlane.f32.xlu0 %v1289_v61 }
 0x8c4   : > { %v1288_v62 = vpop.xlane.xlu1 %1287 }
 0x8c5   : > { %v1292_v63 = vmul.f32 0.03125, %v1288_v62 }
 0x8c7   : > { %v1294_v0 = vsub.f32 %v1284_v55, %v1292_v63 }
 0x8c8   : > { %v1291_v1 = vpop.xlane.xlu0 %1290 }
 0x8c9   : > { %v1293_v2 = vmul.f32 0.03125, %v1291_v1  ;;  %v1296_v3 = vmul.f32 %v1294_v0, %v1294_v0 }
 0x8cb   : > { %v1295_v4 = vsub.f32 %v1285_v60, %v1293_v2  ;;  %v1298_v6 = vsel %vm432_vm2, %v1296_v3, 0.0 }
 0x8cc   : > { %1299 = vadd.xlane.f32.xlu1 %v1298_v6 }
 0x8cd   : > { %v1297_v7 = vmul.f32 %v1295_v4, %v1295_v4 }
 0x8cf   : > { %v1301_v8 = vsel %vm432_vm2, %v1297_v7, 0.0 }
 0x8d0   : > { %1302 = vadd.xlane.f32.xlu0 %v1301_v8 }
 0x955   : > { %v1300_v11 = vpop.xlane.xlu1 %1299 }
 0x956   : > { %v1304_v12 = vmul.f32 0.03125, %v1300_v11 }
 0x958   : > { %v1306_v13 = vadd.f32 1e-05, %v1304_v12 }
 0x959   : > { %v1303_v14 = vpop.xlane.xlu0 %1302 }
 0x95a   : > { %1728 = vrsqrt.f32 %v1306_v13  ;;  %v1305_v15 = vmul.f32 0.03125, %v1303_v14 }
 0x95c   : > { %v1307_v16 = vadd.f32 1e-05, %v1305_v15 }
 0x95e   : > { %1730 = vrsqrt.f32 %v1307_v16 }
 0x967   : > { %v1729_v19 = vpop.eup %1728 }
 0x968   : > { %v1310_v20 = vmul.f32 %v1729_v19, %v1294_v0 }
 0x96a   : > { %v1316_v22 = vmul.f32 %v1315_v18, %v1310_v20 }
 0x96b   : > { %v1731_v23 = vpop.eup %1730 }
 0x96c   : > { %v1322_v24 = vadd.f32 %v1516_v21, %v1316_v22  ;;  %v1311_v25 = vmul.f32 %v1731_v23, %v1295_v4 }
 0x96e   : > { %1324 = vst.msk [vmem:[#allocation2] sm:$0xff] %vm432_vm2, %v1322_v24  ;;  %v1317_v26 = vmul.f32 %v1315_v18, %v1311_v25  ;;  %1329 = sbr.rel (%p1517_p6) target bundleno = 2420 (0x974), region = 56 }
 0x970   : > { %v1323_v27 = vadd.f32 %v1516_v21, %v1317_v26 }
 0x972   : > { %1325 = vst.msk [vmem:[#allocation2 + $0x8] sm:$0xff] %vm432_vm2, %v1323_v27 }
 0x973   : > { %1330 = vst.msk [vmem:[#allocation4] sm:$0xff] %vm432_vm2, %v1322_v24  ;;  %1331 = vst.msk [vmem:[#allocation4 + $0x8] sm:$0xff] %vm432_vm2, %v1323_v27 }
 0x974 PF: > { %p2013_p7 = scmp.eq.s32.totalorder %s1466_s27, 1  ;;  %s1793_s20 = smov [#allocation4]  }
 0x975   : > { %s1341_s22 = sshll.u32 %s1793_s20, 4  ;;  %s1342_s22 = int_to_ptr.vmem [resolvable:$true] %s1341_s22 }
 0x976   : > { %s1732_s23 = scalar_lea.vmem %s1342_s22, 256  ;;  %p1739_p11 = scmp.lt.s32.totalorder %s1342_s22, %s1342_s22 }
 0x977   : > { %p1733_p8 = scmp.ne.s32.totalorder %s1342_s22, %s1732_s23  ;;  %p1740_p12 = scmp.lt.s32.totalorder %s1732_s23, %s1732_s23 }
 0x979   : > { %p1734_p9 = pnand %p1733_p8, %p2013_p7  ;;  %p1741_p13 = por %p1740_p12, %p1739_p11 }
 0x97b   : > { %p1735_p10 = pneg %p1734_p9 }
 0x97d   : > { %p1742_p0 = pnand %p1741_p13, %p1735_p10 }
 0x97f   : > { %1745 = shalt.err (!%p1742_p0)
}
 0x980   : > { %s1794_s24 = smov 128   ;;  %s1795_s27 = smov 8  }
 0x981   : > { %1656 = dma.vmem_to_hbm [thread:$0]  (%p2013_p7), %s1342_s22, 256, %s2044_s7, [#allocation5], %s1794_s24, %s1794_s24, %s1795_s27  }
 0x982   : > { %1769 = dma.done.wait (%p2013_p7), [#allocation5], 256  }
 0x983   : > { %1771 = vsyncadd (%p2013_p7), [#allocation5], 4294967040 }
 0x984 PF: > { %s18_s26 = sadd.s32 1, %s1782_s26   ;;  %s2046_s24 = smov %s1778_s25 }
 0x985   : > { %p15_p1 = scmp.ge.s32.totalorder %s18_s26, 4   ;;  %s2047_s25 = smov %s2049_s28 }
 0x987   :  { %17 = sbr.rel (!%p15_p1) target bundleno = 2 (0x2), region = 102 }
 0x98c   :  { %1357 = vsyncpa [#allocation5], 1 }
 0x98d   :  { %1359 = vsyncpa [#allocation5 + $0x1], 1 }

</bundles_post_ra>
